<compile_context>
chip_gen: v7x
topology: tpu7x:2x2x1
jax: 0.10.0
libtpu: 0.0.40
codegen_flags: <defaults>
</compile_context>

<pallas_src>
import jax
import jax.numpy as jnp
import numpy as np
from jax import lax
from jax.experimental import pallas as pl
from jax.experimental.pallas import tpu as pltpu

KH, KW = 3, 3
EPS = 1e-5


# ---------------------------------------------------------------------------
# Kernel 1: 3x3 conv (stride 1, pad 1, no bias) + fused per-batch channel stats
# ---------------------------------------------------------------------------
def conv_stats_kernel(x_ref, b_ref, sel_ref, y_ref, stats_ref, xpad):
    # x_ref    : (1, H, W*Cin)        one batch element, unpadded, lane-flattened NHWC
    # b_ref    : (KH, W*Cin, W*Cout)  banded weight matrices (kw taps + W-padding folded in)
    # sel_ref  : (W*Cout, Cout)       channel-sum selector (sel[w*Cout + c, c] = 1)
    # y_ref    : (1, H, W*Cout)       conv output (lane-dense)
    # stats_ref: (1, 2, Cout)         [channel sum, channel sum-of-squares] for this batch elem
    # xpad     : (H+2, W*Cin)         VMEM scratch: rows 1..H hold x, rows 0 and H+1 are zero
    H = y_ref.shape[1]
    WCo = y_ref.shape[2]
    WCi = x_ref.shape[2]

    # In-kernel height halo (pad=1 along H): zero border rows (cheap: 2 rows) + interior copy.
    xpad[0:1, :] = jnp.zeros((1, WCi), xpad.dtype)
    xpad[H + 1:H + 2, :] = jnp.zeros((1, WCi), xpad.dtype)
    xpad[1:H + 1, :] = x_ref[0]

    # 3 matmuls (one per kh); shifted windows are read directly from the scratch ref
    # (different vld base address, no in-register sublane shuffling).
    acc = jnp.zeros((H, WCo), jnp.float32)
    for kh in range(KH):                                    # static, unrolled
        acc = acc + jnp.dot(xpad[kh:kh + H, :], b_ref[kh],
                            preferred_element_type=jnp.float32)

    y_ref[0] = acc.astype(y_ref.dtype)                      # unmasked 128-lane stores

    # Fused BN statistics: one pass (sum and sum of squares), reduced to per-channel
    # values with a tiny selector matmul (avoids a lane->sublane relayout).
    colsum = jnp.sum(acc, axis=0, keepdims=True)            # (1, W*Cout)
    colssq = jnp.sum(acc * acc, axis=0, keepdims=True)      # (1, W*Cout)
    both = jnp.concatenate([colsum, colssq], axis=0)        # (2, W*Cout)
    stats_ref[0] = jnp.dot(both, sel_ref[...],
                           preferred_element_type=jnp.float32)   # (2, Cout)


# ---------------------------------------------------------------------------
# Kernel 2: BatchNorm apply (y * scale + shift), scale/shift pre-folded per channel
# ---------------------------------------------------------------------------
def bn_apply_kernel(y_ref, scale_ref, shift_ref, o_ref):
    # y_ref: (1, H, W*Cout); scale_ref/shift_ref: (1, W*Cout); o_ref: (1, H, W*Cout)
    o_ref[0] = y_ref[0] * scale_ref[...] + shift_ref[...]


# ---------------------------------------------------------------------------
# Wrapper
# ---------------------------------------------------------------------------
@jax.jit
def conv_bn_2d(x_nchw, weight_oihw, gamma, beta):
    """x_nchw: (N, Cin, H, W) f32; weight_oihw: (Cout, Cin, 3, 3); gamma/beta: (Cout,)."""
    N, Cin, H, W = x_nchw.shape
    Cout = weight_oihw.shape[0]
    WCi, WCo = W * Cin, W * Cout

    # glue (layout plumbing): NCHW -> (N, H, W*Cin); no jnp.pad (halo handled in-kernel).
    x_flat = jnp.transpose(x_nchw, (0, 2, 3, 1)).reshape(N, H, WCi)

    # Weight preprocessing (once, O(9*W*Cin*Cout) — no activation data touched):
    # B[kh, s*Cin+ci, w*Cout+co] = weight[co, ci, kh, kw] where kw = s - w + 1 in [0, 3),
    # i.e. the kw taps and the width padding are folded into a banded matrix per kh.
    w_hwio = jnp.transpose(weight_oihw, (2, 3, 1, 0)).astype(jnp.float32)  # (KH, KW, Cin, Cout)
    s_idx = jnp.arange(W)[None, :, None]
    w_idx = jnp.arange(W)[None, None, :]
    kw_idx = jnp.arange(KW)[:, None, None]
    ind = (s_idx == w_idx + kw_idx - 1).astype(jnp.float32)                # (KW, W, W)
    B = jnp.einsum('ksw,hkio->hsiwo', ind, w_hwio).reshape(KH, WCi, WCo)

    # Channel-sum selector: (W*Cout, Cout), sel[w*Cout + c, c] = 1.
    sel = (jnp.arange(WCo)[:, None] % Cout == jnp.arange(Cout)[None, :]).astype(jnp.float32)

    conv_cost = pl.CostEstimate(
        flops=2 * N * KH * H * WCi * WCo,
        transcendentals=0,
        bytes_accessed=4 * (N * H * WCi + KH * WCi * WCo + WCo * Cout
                            + N * H * WCo + N * 2 * Cout))

    # --- conv + fused stats kernel: grid over batch ---
    # TODO(synk): for realistic (large H, W, C) shapes add spatial H-tiling to the grid and
    # set vmem_limit_bytes per TPU generation (v7x has 64 MiB physical VMEM); on v5e, cast
    # the matmul operands to bf16 for the main compute win.  Not needed at these toy shapes.
    y_flat, stats = pl.pallas_call(
        conv_stats_kernel,
        out_shape=(jax.ShapeDtypeStruct((N, H, WCo), jnp.float32),
                   jax.ShapeDtypeStruct((N, 2, Cout), jnp.float32)),
        grid_spec=pltpu.PrefetchScalarGridSpec(
            num_scalar_prefetch=0,
            grid=(N,),
            in_specs=[
                pl.BlockSpec((1, H, WCi), lambda n: (n, 0, 0)),
                pl.BlockSpec((KH, WCi, WCo), lambda n: (0, 0, 0)),
                pl.BlockSpec((WCo, Cout), lambda n: (0, 0)),
            ],
            out_specs=[
                pl.BlockSpec((1, H, WCo), lambda n: (n, 0, 0)),
                pl.BlockSpec((1, 2, Cout), lambda n: (n, 0, 0)),
            ],
            scratch_shapes=[pltpu.VMEM((H + 2, WCi), jnp.float32)],
        ),
        compiler_params=pltpu.CompilerParams(dimension_semantics=("parallel",)),
        cost_estimate=conv_cost,
    )(x_flat, B, sel)

    # Finalize batch statistics (tiny: 2*Cout numbers) and fold into per-channel scale/shift.
    # var = E[y^2] - E[y]^2 (biased, training-mode BN), clamped at 0.
    n_elem = N * H * W
    ch_sum = jnp.sum(stats[:, 0, :], axis=0)
    ch_ssq = jnp.sum(stats[:, 1, :], axis=0)
    mean = ch_sum / n_elem
    var = jnp.maximum(ch_ssq / n_elem - mean * mean, 0.0)
    inv = lax.rsqrt(var + EPS)
    scale = gamma * inv
    shift = beta - mean * scale
    scale_row = jnp.tile(scale, W).reshape(1, WCo)   # scale_row[0, w*Cout + c] = scale[c]
    shift_row = jnp.tile(shift, W).reshape(1, WCo)
    # TODO(synk): running_mean/running_var momentum updates and the cross-device stat sync of
    # SynchronizedBatchNorm2d are not modeled (they do not affect the training-mode forward output).

    bn_cost = pl.CostEstimate(
        flops=2 * N * H * WCo,
        transcendentals=0,
        bytes_accessed=4 * (2 * N * H * WCo + 2 * WCo))

    # --- BN apply kernel: tiled, lane-dense, output aliased onto the conv-output buffer ---
    out_flat = pl.pallas_call(
        bn_apply_kernel,
        out_shape=jax.ShapeDtypeStruct((N, H, WCo), jnp.float32),
        grid_spec=pltpu.PrefetchScalarGridSpec(
            num_scalar_prefetch=0,
            grid=(N,),
            in_specs=[
                pl.BlockSpec((1, H, WCo), lambda n: (n, 0, 0)),
                pl.BlockSpec((1, WCo), lambda n: (0, 0)),
                pl.BlockSpec((1, WCo), lambda n: (0, 0)),
            ],
            out_specs=pl.BlockSpec((1, H, WCo), lambda n: (n, 0, 0)),
        ),
        input_output_aliases={0: 0},
        compiler_params=pltpu.CompilerParams(dimension_semantics=("parallel",)),
        cost_estimate=bn_cost,
    )(y_flat, scale_row, shift_row)

    # glue: back to NCHW (PyTorch convention)
    return jnp.transpose(out_flat.reshape(N, H, W, Cout), (0, 3, 1, 2))


# ---------------------------------------------------------------------------
# Pure-JAX reference (for a silent correctness check)
# ---------------------------------------------------------------------------
def conv_bn_2d_ref(x_nchw, weight_oihw, gamma, beta):
    y = lax.conv_general_dilated(
        x_nchw, weight_oihw, window_strides=(1, 1), padding=((1, 1), (1, 1)),
        dimension_numbers=("NCHW", "OIHW", "NCHW"))
    mean = jnp.mean(y, axis=(0, 2, 3), keepdims=True)
    var = jnp.mean((y - mean) ** 2, axis=(0, 2, 3), keepdims=True)
    yhat = (y - mean) * lax.rsqrt(var + EPS)
    return yhat * gamma.reshape(1, -1, 1, 1) + beta.reshape(1, -1, 1, 1)


if __name__ == "__main__":
    key = jax.random.PRNGKey(0)
    k_x, k_w, k_g, k_b = jax.random.split(key, 4)

    N, Cin, Cout, H, W = 2, 4, 8, 16, 16

    x = jax.random.normal(k_x, (N, Cin, H, W), dtype=jnp.float32)
    # Conv2d weight shape: (out_channels, in_channels, 3, 3), no bias.
    weight = jax.random.normal(k_w, (Cout, Cin, KH, KW), dtype=jnp.float32) * 0.1
    # BN affine params (PyTorch inits to ones/zeros; perturb to exercise broadcasting).
    gamma = 1.0 + 0.1 * jax.random.normal(k_g, (Cout,), dtype=jnp.float32)
    beta = 0.1 * jax.random.normal(k_b, (Cout,), dtype=jnp.float32)

    out = conv_bn_2d(x, weight, gamma, beta)
    out = jax.block_until_ready(out)

    ref = conv_bn_2d_ref(x, weight, gamma, beta)
    np.testing.assert_allclose(np.asarray(out), np.asarray(ref), rtol=1e-4, atol=1e-4)

    print("KERNEL_OK")
</pallas_src>

<mosaic_0001>
module attributes {stable_mosaic.version = 11 : i64} {
  func.func @conv_stats_kernel(%arg0: i32, %arg1: memref<1x16x64xf32, #tpu.memory_space<vmem>>, %arg2: memref<3x64x128xf32, #tpu.memory_space<vmem>>, %arg3: memref<128x8xf32, #tpu.memory_space<vmem>>, %arg4: memref<1x16x128xf32, #tpu.memory_space<vmem>>, %arg5: memref<1x2x8xf32, #tpu.memory_space<vmem>>, %arg6: memref<18x64xf32, #tpu.memory_space<vmem>>) attributes {dimension_semantics = [#tpu.dimension_semantics<parallel>], iteration_bounds = array<i64: 2>, scalar_prefetch = 0 : i64, scratch_operands = 1 : i64, tpu.core_type = #tpu.core_type<tc>, window_params = [{transform_indices = @transform_0, window_bounds = array<i64: 1, 16, 64>}, {pipeline_mode = #tpu.pipeline_mode<synchronous>, transform_indices = @transform_1, window_bounds = array<i64: 3, 64, 128>}, {pipeline_mode = #tpu.pipeline_mode<synchronous>, transform_indices = @transform_2, window_bounds = array<i64: 128, 8>}, {transform_indices = @transform_3, window_bounds = array<i64: 1, 16, 128>}, {transform_indices = @transform_4, window_bounds = array<i64: 1, 2, 8>}]} {
    %cst = arith.constant 0.000000e+00 : f32
    %0 = vector.broadcast %cst : f32 to vector<1x64xf32>
    %c0 = arith.constant 0 : index
    %c0_0 = arith.constant 0 : index
    %1 = vector.load %arg6[%c0, %c0_0] : memref<18x64xf32, #tpu.memory_space<vmem>>, vector<1x64xf32>
    tpu.vector_store %arg6[%c0, %c0_0], %0 {strides = array<i32>} : memref<18x64xf32, #tpu.memory_space<vmem>>, vector<1x64xf32>,
    %cst_1 = arith.constant 0.000000e+00 : f32
    %2 = vector.broadcast %cst_1 : f32 to vector<1x64xf32>
    %c17 = arith.constant 17 : index
    %c0_2 = arith.constant 0 : index
    %3 = vector.load %arg6[%c17, %c0_2] : memref<18x64xf32, #tpu.memory_space<vmem>>, vector<1x64xf32>
    tpu.vector_store %arg6[%c17, %c0_2], %2 {strides = array<i32>} : memref<18x64xf32, #tpu.memory_space<vmem>>, vector<1x64xf32>,
    %c0_3 = arith.constant 0 : index
    %c0_4 = arith.constant 0 : index
    %c0_5 = arith.constant 0 : index
    %4 = vector.load %arg1[%c0_3, %c0_4, %c0_5] : memref<1x16x64xf32, #tpu.memory_space<vmem>>, vector<1x16x64xf32>
    %5 = vector.shape_cast %4 : vector<1x16x64xf32> to vector<16x64xf32>
    %c1 = arith.constant 1 : index
    %c0_6 = arith.constant 0 : index
    %6 = vector.load %arg6[%c1, %c0_6] : memref<18x64xf32, #tpu.memory_space<vmem>>, vector<16x64xf32>
    tpu.vector_store %arg6[%c1, %c0_6], %5 {strides = array<i32>} : memref<18x64xf32, #tpu.memory_space<vmem>>, vector<16x64xf32>,
    %cst_7 = arith.constant 0.000000e+00 : f32
    %7 = vector.broadcast %cst_7 : f32 to vector<16x128xf32>
    %c0_8 = arith.constant 0 : index
    %c0_9 = arith.constant 0 : index
    %8 = vector.load %arg6[%c0_8, %c0_9] : memref<18x64xf32, #tpu.memory_space<vmem>>, vector<16x64xf32>
    %c0_10 = arith.constant 0 : index
    %c0_11 = arith.constant 0 : index
    %c0_12 = arith.constant 0 : index
    %9 = vector.load %arg2[%c0_10, %c0_11, %c0_12] : memref<3x64x128xf32, #tpu.memory_space<vmem>>, vector<1x64x128xf32>
    %10 = vector.shape_cast %9 : vector<1x64x128xf32> to vector<64x128xf32>
    %cst_13 = arith.constant dense<0.000000e+00> : vector<16x128xf32>
    %11 = tpu.matmul %8, %10, %cst_13 {dimension_numbers = #tpu.dot_dimension_numbers<[1], [0], [0], [1], [0, 0, 1, 1], [], []>} : vector<16x64xf32>, vector<64x128xf32>, vector<16x128xf32> -> vector<16x128xf32>
    %12 = arith.addf %7, %11 : vector<16x128xf32>
    %c1_14 = arith.constant 1 : index
    %c0_15 = arith.constant 0 : index
    %13 = vector.load %arg6[%c1_14, %c0_15] : memref<18x64xf32, #tpu.memory_space<vmem>>, vector<16x64xf32>
    %c1_16 = arith.constant 1 : index
    %c0_17 = arith.constant 0 : index
    %c0_18 = arith.constant 0 : index
    %14 = vector.load %arg2[%c1_16, %c0_17, %c0_18] : memref<3x64x128xf32, #tpu.memory_space<vmem>>, vector<1x64x128xf32>
    %15 = vector.shape_cast %14 : vector<1x64x128xf32> to vector<64x128xf32>
    %cst_19 = arith.constant dense<0.000000e+00> : vector<16x128xf32>
    %16 = tpu.matmul %13, %15, %cst_19 {dimension_numbers = #tpu.dot_dimension_numbers<[1], [0], [0], [1], [0, 0, 1, 1], [], []>} : vector<16x64xf32>, vector<64x128xf32>, vector<16x128xf32> -> vector<16x128xf32>
    %17 = arith.addf %12, %16 : vector<16x128xf32>
    %c2 = arith.constant 2 : index
    %c0_20 = arith.constant 0 : index
    %18 = vector.load %arg6[%c2, %c0_20] : memref<18x64xf32, #tpu.memory_space<vmem>>, vector<16x64xf32>
    %c2_21 = arith.constant 2 : index
    %c0_22 = arith.constant 0 : index
    %c0_23 = arith.constant 0 : index
    %19 = vector.load %arg2[%c2_21, %c0_22, %c0_23] : memref<3x64x128xf32, #tpu.memory_space<vmem>>, vector<1x64x128xf32>
    %20 = vector.shape_cast %19 : vector<1x64x128xf32> to vector<64x128xf32>
    %cst_24 = arith.constant dense<0.000000e+00> : vector<16x128xf32>
    %21 = tpu.matmul %18, %20, %cst_24 {dimension_numbers = #tpu.dot_dimension_numbers<[1], [0], [0], [1], [0, 0, 1, 1], [], []>} : vector<16x64xf32>, vector<64x128xf32>, vector<16x128xf32> -> vector<16x128xf32>
    %22 = arith.addf %17, %21 : vector<16x128xf32>
    %c0_25 = arith.constant 0 : index
    %c0_26 = arith.constant 0 : index
    %c0_27 = arith.constant 0 : index
    %23 = vector.load %arg4[%c0_25, %c0_26, %c0_27] : memref<1x16x128xf32, #tpu.memory_space<vmem>>, vector<1x16x128xf32>
    %24 = vector.shape_cast %23 : vector<1x16x128xf32> to vector<16x128xf32>
    %25 = vector.shape_cast %22 : vector<16x128xf32> to vector<1x16x128xf32>
    tpu.vector_store %arg4[%c0_25, %c0_26, %c0_27], %25 {strides = array<i32>} : memref<1x16x128xf32, #tpu.memory_space<vmem>>, vector<1x16x128xf32>,
    %cst_28 = arith.constant dense<0.000000e+00> : vector<128xf32>
    %26 = vector.multi_reduction <add>, %22, %cst_28 [0] : vector<16x128xf32> to vector<128xf32>
    %27 = vector.shape_cast %26 : vector<128xf32> to vector<1x128xf32>
    %28 = arith.mulf %22, %22 : vector<16x128xf32>
    %cst_29 = arith.constant dense<0.000000e+00> : vector<128xf32>
    %29 = vector.multi_reduction <add>, %28, %cst_29 [0] : vector<16x128xf32> to vector<128xf32>
    %30 = vector.shape_cast %29 : vector<128xf32> to vector<1x128xf32>
    %31 = tpu.concatenate %27, %30 in 0 : vector<1x128xf32>, vector<1x128xf32> -> vector<2x128xf32>
    %c0_30 = arith.constant 0 : index
    %c0_31 = arith.constant 0 : index
    %32 = vector.load %arg3[%c0_30, %c0_31] : memref<128x8xf32, #tpu.memory_space<vmem>>, vector<128x8xf32>
    %cst_32 = arith.constant dense<0.000000e+00> : vector<2x8xf32>
    %33 = tpu.matmul %31, %32, %cst_32 {dimension_numbers = #tpu.dot_dimension_numbers<[1], [0], [0], [1], [0, 0, 1, 1], [], []>} : vector<2x128xf32>, vector<128x8xf32>, vector<2x8xf32> -> vector<2x8xf32>
    %c0_33 = arith.constant 0 : index
    %c0_34 = arith.constant 0 : index
    %c0_35 = arith.constant 0 : index
    %34 = vector.load %arg5[%c0_33, %c0_34, %c0_35] : memref<1x2x8xf32, #tpu.memory_space<vmem>>, vector<1x2x8xf32>
    %35 = vector.shape_cast %34 : vector<1x2x8xf32> to vector<2x8xf32>
    %36 = vector.shape_cast %33 : vector<2x8xf32> to vector<1x2x8xf32>
    tpu.vector_store %arg5[%c0_33, %c0_34, %c0_35], %36 {strides = array<i32>} : memref<1x2x8xf32, #tpu.memory_space<vmem>>, vector<1x2x8xf32>,
    return
  }
  func.func @transform_0(%arg0: i32) -> (i32, i32, i32) {
    %c0_i32 = arith.constant 0 : i32
    %c0_i32_0 = arith.constant 0 : i32
    %c0_i32_1 = arith.constant 0 : i32
    return %arg0, %c0_i32, %c0_i32_0 : i32, i32, i32
  }
  func.func @transform_1(%arg0: i32) -> (i32, i32, i32) {
    %c0_i32 = arith.constant 0 : i32
    %c0_i32_0 = arith.constant 0 : i32
    %c0_i32_1 = arith.constant 0 : i32
    %c0_i32_2 = arith.constant 0 : i32
    return %c0_i32, %c0_i32_0, %c0_i32_1 : i32, i32, i32
  }
  func.func @transform_2(%arg0: i32) -> (i32, i32) {
    %c0_i32 = arith.constant 0 : i32
    %c0_i32_0 = arith.constant 0 : i32
    %c0_i32_1 = arith.constant 0 : i32
    return %c0_i32, %c0_i32_0 : i32, i32
  }
  func.func @transform_3(%arg0: i32) -> (i32, i32, i32) {
    %c0_i32 = arith.constant 0 : i32
    %c0_i32_0 = arith.constant 0 : i32
    %c0_i32_1 = arith.constant 0 : i32
    return %arg0, %c0_i32, %c0_i32_0 : i32, i32, i32
  }
  func.func @transform_4(%arg0: i32) -> (i32, i32, i32) {
    %c0_i32 = arith.constant 0 : i32
    %c0_i32_0 = arith.constant 0 : i32
    %c0_i32_1 = arith.constant 0 : i32
    return %arg0, %c0_i32, %c0_i32_0 : i32, i32, i32
  }
}

module attributes {stable_mosaic.version = 11 : i64} {
  func.func @bn_apply_kernel(%arg0: i32, %arg1: memref<1x16x128xf32, #tpu.memory_space<vmem>>, %arg2: memref<1x128xf32, #tpu.memory_space<vmem>>, %arg3: memref<1x128xf32, #tpu.memory_space<vmem>>, %arg4: memref<1x16x128xf32, #tpu.memory_space<vmem>>) attributes {dimension_semantics = [#tpu.dimension_semantics<parallel>], iteration_bounds = array<i64: 2>, scalar_prefetch = 0 : i64, scratch_operands = 0 : i64, tpu.core_type = #tpu.core_type<tc>, window_params = [{transform_indices = @transform_0, window_bounds = array<i64: 1, 16, 128>}, {pipeline_mode = #tpu.pipeline_mode<synchronous>, transform_indices = @transform_1, window_bounds = array<i64: 1, 128>}, {pipeline_mode = #tpu.pipeline_mode<synchronous>, transform_indices = @transform_2, window_bounds = array<i64: 1, 128>}, {transform_indices = @transform_3, window_bounds = array<i64: 1, 16, 128>}]} {
    %c0 = arith.constant 0 : index
    %c0_0 = arith.constant 0 : index
    %c0_1 = arith.constant 0 : index
    %0 = vector.load %arg1[%c0, %c0_0, %c0_1] : memref<1x16x128xf32, #tpu.memory_space<vmem>>, vector<1x16x128xf32>
    %1 = vector.shape_cast %0 : vector<1x16x128xf32> to vector<16x128xf32>
    %c0_2 = arith.constant 0 : index
    %c0_3 = arith.constant 0 : index
    %2 = vector.load %arg2[%c0_2, %c0_3] : memref<1x128xf32, #tpu.memory_space<vmem>>, vector<1x128xf32>
    %3 = vector.broadcast %2 : vector<1x128xf32> to vector<16x128xf32>
    %4 = arith.mulf %1, %3 : vector<16x128xf32>
    %c0_4 = arith.constant 0 : index
    %c0_5 = arith.constant 0 : index
    %5 = vector.load %arg3[%c0_4, %c0_5] : memref<1x128xf32, #tpu.memory_space<vmem>>, vector<1x128xf32>
    %6 = vector.broadcast %5 : vector<1x128xf32> to vector<16x128xf32>
    %7 = arith.addf %4, %6 : vector<16x128xf32>
    %c0_6 = arith.constant 0 : index
    %c0_7 = arith.constant 0 : index
    %c0_8 = arith.constant 0 : index
    %8 = vector.load %arg4[%c0_6, %c0_7, %c0_8] : memref<1x16x128xf32, #tpu.memory_space<vmem>>, vector<1x16x128xf32>
    %9 = vector.shape_cast %8 : vector<1x16x128xf32> to vector<16x128xf32>
    %10 = vector.shape_cast %7 : vector<16x128xf32> to vector<1x16x128xf32>
    tpu.vector_store %arg4[%c0_6, %c0_7, %c0_8], %10 {strides = array<i32>} : memref<1x16x128xf32, #tpu.memory_space<vmem>>, vector<1x16x128xf32>,
    return
  }
  func.func @transform_0(%arg0: i32) -> (i32, i32, i32) {
    %c0_i32 = arith.constant 0 : i32
    %c0_i32_0 = arith.constant 0 : i32
    %c0_i32_1 = arith.constant 0 : i32
    return %arg0, %c0_i32, %c0_i32_0 : i32, i32, i32
  }
  func.func @transform_1(%arg0: i32) -> (i32, i32) {
    %c0_i32 = arith.constant 0 : i32
    %c0_i32_0 = arith.constant 0 : i32
    %c0_i32_1 = arith.constant 0 : i32
    return %c0_i32, %c0_i32_0 : i32, i32
  }
  func.func @transform_2(%arg0: i32) -> (i32, i32) {
    %c0_i32 = arith.constant 0 : i32
    %c0_i32_0 = arith.constant 0 : i32
    %c0_i32_1 = arith.constant 0 : i32
    return %c0_i32, %c0_i32_0 : i32, i32
  }
  func.func @transform_3(%arg0: i32) -> (i32, i32, i32) {
    %c0_i32 = arith.constant 0 : i32
    %c0_i32_0 = arith.constant 0 : i32
    %c0_i32_1 = arith.constant 0 : i32
    return %arg0, %c0_i32, %c0_i32_0 : i32, i32, i32
  }
}

</mosaic_0001>

<bundles_post_ra>
// kernel: tile.13
= control target key start
LH: loop header
LB: loop body
LE: loop exit
PB: predicated region body
PF: predicated region fallthrough
CT: control target
= control target key end

     0   :  { %s28_s0 = inlined_call_operand.vmem [shape: f32[8], index: 0, kind: input, shape index: {}]   ;;  %s29_s1 = inlined_call_operand.vmem [shape: f32[16,8], index: 1, kind: output, shape index: {}]  }
   0x1   :  { %v4_v0 = vld [vmem:[%s28_s0] ss:$0 sm:$0xff] }
   0x2   :  { %5 = vst [vmem:[%s29_s1] sm:$0xff] %v4_v0  ;;  %8 = vst [vmem:[%s29_s1 + $0x8] sm:$0xff] %v4_v0 }

// kernel: tile.14
= control target key start
LH: loop header
LB: loop body
LE: loop exit
PB: predicated region body
PF: predicated region fallthrough
CT: control target
= control target key end

     0   :  { %s131_s10 = smov 120   ;;  %s132_s11 = smov 104   ;;  %vm3_vm0 = vcmask 64512   ;;  %vm9_vm1 = vcmask 1048512   ;;  %vm15_vm2 = vcmask 982912   ;;  %vm21_vm3 = vcmask 917312   ;;  %s207_s0 = inlined_call_operand.vmem [shape: f32[16,8], index: 0, kind: input, shape index: {}]   ;;  %s208_s1 = inlined_call_operand.vmem [shape: f32[1,128], index: 1, kind: output, shape index: {}]  }
   0x1   :  { %v101_v0 = vld [vmem:[%s207_s0 + $0xf] sm:$0x1]   ;;  %v103_v1 = vld [vmem:[%s207_s0 + $0xd] sm:$0x1]   ;;  %v102_v2 = vld [vmem:[%s207_s0 + $0xe] sm:$0x1]  }
   0x2   :  { %7 = vrot.lane.b32.xlu0 %v101_v0, %s131_s10  ;;  %19 = vrot.lane.b32.xlu1 %v103_v1, %s132_s11  ;;  %v104_v3 = vld [vmem:[%s207_s0 + $0xc] sm:$0x1]   ;;  %s133_s16 = smov 112   ;;  %s134_s17 = smov 96   ;;  %v105_v4 = vld [vmem:[%s207_s0 + $0xb] sm:$0x1]  }
   0x3   :  { %v106_v5 = vld [vmem:[%s207_s0 + $0xa] sm:$0x1]   ;;  %v2_v6 = vld [vmem:[%s207_s0] sm:$0x1]   ;;  %s135_s24 = smov 88   ;;  %s136_s25 = smov 80  }
   0x4   :  { %4 = vst.msk [vmem:[#allocation0] sm:$0x1] %vm3_vm0, %v2_v6   ;;  %v107_v7 = vld [vmem:[%s207_s0 + $0x9] sm:$0x1]   ;;  %v108_v8 = vld [vmem:[%s207_s0 + $0x8] sm:$0x1]  }
   0x5   :  { %s137_s30 = smov 72   ;;  %s138_s2 = smov 64   ;;  %v109_v9 = vld [vmem:[%s207_s0 + $0x7] sm:$0x1]   ;;  %v110_v10 = vld [vmem:[%s207_s0 + $0x6] sm:$0x1]  }
   0x6   :  { %13 = vrot.lane.b32.xlu0 %v102_v2, %s133_s16  ;;  %25 = vrot.lane.b32.xlu1 %v104_v3, %s134_s17  ;;  %s139_s7 = smov 56   ;;  %s140_s8 = smov 48   ;;  %v111_v11 = vld [vmem:[%s207_s0 + $0x5] sm:$0x1]   ;;  %v112_v12 = vld [vmem:[%s207_s0 + $0x4] sm:$0x1]  }
   0x7   :  { %s141_s13 = smov 40   ;;  %s142_s14 = smov 32   ;;  %v113_v13 = vld [vmem:[%s207_s0 + $0x3] sm:$0x1]   ;;  %v114_v14 = vld [vmem:[%s207_s0 + $0x2] sm:$0x1]  }
   0x8   :  { %s143_s19 = smov 24   ;;  %s144_s20 = smov 16   ;;  %v115_v15 = vld [vmem:[%s207_s0 + $0x1] sm:$0x1]   ;;  %vm27_vm4 = vcmask 851712   ;;  %vm33_vm5 = vcmask 786112  }
   0x9   :  { %s145_s0 = smov 8   ;;  %vm39_vm6 = vcmask 720512   ;;  %vm45_vm7 = vcmask 654912   ;;  %vm51_vm8 = vcmask 589312   ;;  %vm57_vm9 = vcmask 523712  }
   0xa   :  { %31 = vrot.lane.b32.xlu0 %v105_v4, %s135_s24  ;;  %37 = vrot.lane.b32.xlu1 %v106_v5, %s136_s25  ;;  %vm63_vm10 = vcmask 458112   ;;  %vm69_vm11 = vcmask 392512   ;;  %vm75_vm12 = vcmask 326912   ;;  %vm81_vm13 = vcmask 261312  }
   0xb   :  { %vm87_vm14 = vcmask 195712   ;;  %vm93_vm15 = vcmask 130112  }
   0xe   :  { %43 = vrot.lane.b32.xlu0 %v107_v7, %s137_s30  ;;  %49 = vrot.lane.b32.xlu1 %v108_v8, %s138_s2 }
  0x12   :  { %55 = vrot.lane.b32.xlu0 %v109_v9, %s139_s7  ;;  %61 = vrot.lane.b32.xlu1 %v110_v10, %s140_s8 }
  0x16   :  { %67 = vrot.lane.b32.xlu0 %v111_v11, %s141_s13  ;;  %73 = vrot.lane.b32.xlu1 %v112_v12, %s142_s14 }
  0x1a   :  { %79 = vrot.lane.b32.xlu0 %v113_v13, %s143_s19  ;;  %85 = vrot.lane.b32.xlu1 %v114_v14, %s144_s20 }
  0x1e   :  { %91 = vrot.lane.b32.xlu0 %v115_v15, %s145_s0 }
  0x74   :  { %v8_v16 = vpop.permute.xlu0 %7   ;;  %v20_v17 = vpop.permute.xlu1 %19  }
  0x75   :  { %10 = vst.msk [vmem:[#allocation0] sm:$0x1] %vm9_vm1, %v8_v16  }
  0x78   :  { %v14_v18 = vpop.permute.xlu0 %13   ;;  %v26_v19 = vpop.permute.xlu1 %25  }
  0x79   :  { %16 = vst.msk [vmem:[#allocation0] sm:$0x1] %vm15_vm2, %v14_v18  }
  0x7a   :  { %22 = vst.msk [vmem:[#allocation0] sm:$0x1] %vm21_vm3, %v20_v17  }
  0x7b   :  { %28 = vst.msk [vmem:[#allocation0] sm:$0x1] %vm27_vm4, %v26_v19  }
  0x7c   :  { %v32_v20 = vpop.permute.xlu0 %31   ;;  %v38_v21 = vpop.permute.xlu1 %37  }
  0x7d   :  { %34 = vst.msk [vmem:[#allocation0] sm:$0x1] %vm33_vm5, %v32_v20  }
  0x7e   :  { %40 = vst.msk [vmem:[#allocation0] sm:$0x1] %vm39_vm6, %v38_v21  }
  0x80   :  { %v44_v22 = vpop.permute.xlu0 %43   ;;  %v50_v23 = vpop.permute.xlu1 %49  }
  0x81   :  { %46 = vst.msk [vmem:[#allocation0] sm:$0x1] %vm45_vm7, %v44_v22  }
  0x82   :  { %52 = vst.msk [vmem:[#allocation0] sm:$0x1] %vm51_vm8, %v50_v23  }
  0x84   :  { %v56_v24 = vpop.permute.xlu0 %55   ;;  %v62_v25 = vpop.permute.xlu1 %61  }
  0x85   :  { %58 = vst.msk [vmem:[#allocation0] sm:$0x1] %vm57_vm9, %v56_v24  }
  0x86   :  { %64 = vst.msk [vmem:[#allocation0] sm:$0x1] %vm63_vm10, %v62_v25  }
  0x88   :  { %v68_v26 = vpop.permute.xlu0 %67   ;;  %v74_v27 = vpop.permute.xlu1 %73  }
  0x89   :  { %70 = vst.msk [vmem:[#allocation0] sm:$0x1] %vm69_vm11, %v68_v26  }
  0x8a   :  { %76 = vst.msk [vmem:[#allocation0] sm:$0x1] %vm75_vm12, %v74_v27  }
  0x8c   :  { %v80_v28 = vpop.permute.xlu0 %79   ;;  %v86_v29 = vpop.permute.xlu1 %85  }
  0x8d   :  { %82 = vst.msk [vmem:[#allocation0] sm:$0x1] %vm81_vm13, %v80_v28  }
  0x8e   :  { %88 = vst.msk [vmem:[#allocation0] sm:$0x1] %vm87_vm14, %v86_v29  }
  0x90   :  { %v92_v30 = vpop.permute.xlu0 %91  }
  0x91   :  { %94 = vst.msk [vmem:[#allocation0] sm:$0x1] %vm93_vm15, %v92_v30  }
  0x98   :  { %v98_v31 = vld [vmem:[#allocation0] sm:$0x1] }
  0x99   :  { %100 = vst [vmem:[%s208_s1] sm:$0x1] %v98_v31 }

// kernel: conv_bn_2d.3
= control target key start
LH: loop header
LB: loop body
LE: loop exit
PB: predicated region body
PF: predicated region fallthrough
CT: control target
= control target key end

     0   :  { %s275_s12 = smov 0   ;;  %s311_s0 = inlined_call_operand.vmem [shape: f32[2,16,128], index: 0, kind: input, shape index: {}, may-alias: {0,3}]   ;;  %s312_s1 = inlined_call_operand.vmem [shape: f32[1,128], index: 1, kind: input, shape index: {}]   ;;  %s313_s2 = inlined_call_operand.vmem [shape: f32[1,128], index: 2, kind: input, shape index: {}]   ;;  %s314_s3 = inlined_call_operand.vmem [shape: f32[2,16,128], index: 3, kind: output, shape index: {}, may-alias: {0,3}]  }
   0x1 LB: > { %s248_s13 = sadd.s32 4294967295, %s277_s12   ;;  %p252_p0 = scmp.ge.s32.totalorder %s277_s12, 1  ;;  %s277_s12 = sphi %s275_s12, %s13_s12  }
   0x2   : > { %p137_p1 = scmp.lt.s32.totalorder %s277_s12, 3 }
   0x4   : > { %p138_p2 = pnand %p252_p0, %p137_p1 }
   0x5   : > { %p161_p3 = scmp.lt.s32.totalorder (!%p138_p2), %s248_s13, 1  ;;  %v257_v0 = vld [vmem:[%s312_s1] ss:$0 sm:$0xff] (!%p138_p2) }
   0x6   : > { %141 = sbr.rel (%p138_p2) target bundleno = 22 (0x16), region = 32  ;;  %v258_v3 = vld [vmem:[%s313_s2] ss:$0 sm:$0xff] (!%p138_p2) }
   0xd   : > { %s316_s13 = smov (!%p161_p3, %s248_s13), 1 }
   0xe   : > { %s261_s14 = sshll.u32 %s316_s13, 4 }
   0xf   : > { %s165_s19 = scalar_lea.vmem %s311_s0, %s261_s14  ;;  %s170_s24 = scalar_lea.vmem %s314_s3, %s261_s14 }
  0x10   : > { %v171_v1 = vld [vmem:[%s165_s19] sm:$0xff]  ;;  %v172_v2 = vld [vmem:[%s165_s19 + $0x8] sm:$0xff] }
  0x11   : > { %v180_v4 = vmul.f32 %v257_v0, %v171_v1  ;;  %v181_v5 = vmul.f32 %v257_v0, %v172_v2 }
  0x13   : > { %v189_v6 = vadd.f32 %v258_v3, %v180_v4  ;;  %v190_v7 = vadd.f32 %v258_v3, %v181_v5 }
  0x15   : > { %191 = vst [vmem:[%s170_s24] sm:$0xff] %v189_v6  ;;  %192 = vst [vmem:[%s170_s24 + $0x8] sm:$0xff] %v190_v7 }
  0x16 PF: > { %s13_s12 = sadd.s32 1, %s277_s12  }
  0x17   : > { %p10_p4 = scmp.ge.s32.totalorder %s13_s12, 4  }
  0x19   :  { %12 = sbr.rel (!%p10_p4) target bundleno = 1 (0x1), region = 62 }

// kernel: conv_bn_2d.2
= control target key start
LH: loop header
LB: loop body
LE: loop exit
PB: predicated region body
PF: predicated region fallthrough
CT: control target
= control target key end

     0   :  { %s986_s15 = smov 0   ;;  %s1153_s0 = inlined_call_operand.vmem [shape: f32[2,16,64], index: 0, kind: input, shape index: {}]   ;;  %s1154_s1 = inlined_call_operand.vmem [shape: f32[3,64,128], index: 1, kind: input, shape index: {}]   ;;  %s1155_s2 = inlined_call_operand.vmem [shape: f32[128,8], index: 2, kind: input, shape index: {}]   ;;  %s1156_s3 = inlined_call_operand.vmem [shape: f32[2,16,128], index: 3, kind: output, shape index: {0}]   ;;  %s1157_s4 = inlined_call_operand.vmem [shape: f32[2,2,8], index: 4, kind: output, shape index: {1}]  }
   0x1 LB: > { %s688_s16 = sadd.s32 4294967295, %s956_s15   ;;  %p692_p0 = scmp.ge.s32.totalorder %s956_s15, 1  ;;  %s956_s15 = sphi %s986_s15, %s15_s15  }
   0x2   : > { %p165_p1 = scmp.lt.s32.totalorder %s956_s15, 3 }
   0x4   : > { %p166_p2 = pnand %p692_p0, %p165_p1 }
   0x5   : > { %v698_v0 = vld [vmem:[%s1154_s1 + $0x40] sm:$0xff] (!%p166_p2)  ;;  %v699_v1 = vld [vmem:[%s1154_s1 + $0x48] sm:$0xff] (!%p166_p2)  ;;  %v700_v2 = vld [vmem:[%s1154_s1 + $0x50] sm:$0xff] (!%p166_p2)  ;;  %p195_p3 = scmp.lt.s32.totalorder (!%p166_p2), %s688_s16, 1  ;;  %vm209_vm0 = vcmask (!%p166_p2), 516096   ;;  %v958_v8 = vmov (!%p166_p2), 0.0  }
   0x6   : > { %169 = sbr.rel (%p166_p2) target bundleno = 501 (0x1f5), region = 32  ;;  %v863_v3 = vpack.c.bf16 (!%p166_p2), %v699_v1, %v698_v0  ;;  %v701_v4 = vld [vmem:[%s1154_s1 + $0x58] sm:$0xff] (!%p166_p2)  ;;  %v702_v6 = vld [vmem:[%s1154_s1 + $0x60] sm:$0xff] (!%p166_p2)  ;;  %v703_v7 = vld [vmem:[%s1154_s1 + $0x68] sm:$0xff] (!%p166_p2)  ;;  %210 = vst.msk [vmem:[#allocation2] sm:$0x1] (!%p166_p2), %vm209_vm0, %v958_v8 }
   0x7   : > { %v867_v5 = vpack.c.bf16 (!%p166_p2), %v701_v4, %v700_v2  ;;  %211 = vst.msk [vmem:[#allocation2 + $0x11] sm:$0x1] (!%p166_p2), %vm209_vm0, %v958_v8  ;;  %v959_v9 = vmov (!%p166_p2), 0.0|0.0   ;;  %vm214_vm1 = vcmask (!%p166_p2), 523264   ;;  %v871_v10 = vpack.c.bf16 (!%p166_p2), %v703_v7, %v702_v6  ;;  %v704_v11 = vld [vmem:[%s1154_s1 + $0x70] sm:$0xff] (!%p166_p2)  ;;  %v705_v12 = vld [vmem:[%s1154_s1 + $0x78] sm:$0xff] (!%p166_p2) }
   0x8   : > { %911 = vmatprep.subr.bf16.mxu1 (!%p166_p2), %v959_v9  ;;  %864 = vmatprep.subr.bf16.mxu0 (!%p166_p2), %v863_v3  ;;  %v514_v15 = vld [vmem:[%s1155_s2] sm:$0xff] (!%p166_p2)  ;;  %v875_v16 = vpack.c.bf16 (!%p166_p2), %v705_v12, %v704_v11  ;;  %v515_v17 = vld [vmem:[%s1155_s2 + $0x8] sm:$0xff] (!%p166_p2)  ;;  %v516_v18 = vld [vmem:[%s1155_s2 + $0x10] sm:$0xff] (!%p166_p2)  ;;  %vm960_vm2 = vmmov (!%p166_p2), 0   ;;  %vm512_vm3 = vcmask (!%p166_p2), 1040384   ;;  %vm600_vm4 = vcmask (!%p166_p2), 58368  }
   0x9   : > { %866 = vmatpush3.bf16.msra.mxu0 (!%p166_p2), %v863_v3  ;;  %v517_v19 = vld [vmem:[%s1155_s2 + $0x18] sm:$0xff] (!%p166_p2)  ;;  %v219_v20 = vld [vmem:[%s1154_s1] sm:$0xff] (!%p166_p2)  ;;  %v220_v21 = vld [vmem:[%s1154_s1 + $0x8] sm:$0xff] (!%p166_p2)  ;;  %v912_v22 = vpack.c.bf16 (!%p166_p2), %v515_v17, %v514_v15  ;;  %860 = vmatprep.mubr.msk.f32.mxu1 (!%p166_p2), %vm960_vm2, %v958_v8 }
   0xa   : > { %868 = vmatprep.subr.bf16.mxu0 (!%p166_p2), %v867_v5  ;;  %v915_v23 = vpack.c.bf16 (!%p166_p2), %v517_v19, %v516_v18  ;;  %v879_v24 = vpack.c.bf16 (!%p166_p2), %v220_v21, %v219_v20  ;;  %v221_v25 = vld [vmem:[%s1154_s1 + $0x10] sm:$0xff] (!%p166_p2)  ;;  %v222_v26 = vld [vmem:[%s1154_s1 + $0x18] sm:$0xff] (!%p166_p2)  ;;  %v518_v28 = vld [vmem:[%s1155_s2 + $0x20] sm:$0xff] (!%p166_p2) }
   0xb   : > { %913 = vmatpush3.bf16.msra.mxu1 (!%p166_p2), %v912_v22  ;;  %v519_v29 = vld [vmem:[%s1155_s2 + $0x28] sm:$0xff] (!%p166_p2)  ;;  %v883_v31 = vpack.c.bf16 (!%p166_p2), %v222_v26, %v221_v25  ;;  %v223_v34 = vld [vmem:[%s1154_s1 + $0x20] sm:$0xff] (!%p166_p2)  ;;  %v225_v37 = vld [vmem:[%s1154_s1 + $0x30] sm:$0xff] (!%p166_p2) }
   0xc   : > { %914 = vmatprep.subr.bf16.mxu1 (!%p166_p2), %v959_v9  ;;  %v918_v33 = vpack.c.bf16 (!%p166_p2), %v519_v29, %v518_v28  ;;  %v224_v35 = vld [vmem:[%s1154_s1 + $0x28] sm:$0xff] (!%p166_p2)  ;;  %v226_v38 = vld [vmem:[%s1154_s1 + $0x38] sm:$0xff] (!%p166_p2)  ;;  %v710_v40 = vld [vmem:[%s1154_s1 + $0x80] sm:$0xff] (!%p166_p2) }
   0xd   : > { %s1159_s16 = smov (!%p195_p3, %s688_s16), 1  ;;  %870 = vmatpush3.bf16.msra.mxu0 %v867_v5  ;;  %v887_v36 = vpack.c.bf16 %v224_v35, %v223_v34  ;;  %v891_v39 = vpack.c.bf16 %v226_v38, %v225_v37  ;;  %v711_v41 = vld [vmem:[%s1154_s1 + $0x88] sm:$0xff]  ;;  %v712_v43 = vld [vmem:[%s1154_s1 + $0x90] sm:$0xff]  ;;  %v713_v44 = vld [vmem:[%s1154_s1 + $0x98] sm:$0xff] }
   0xe   : > { %s722_s29 = sshll.u32 %s1159_s16, 4  ;;  %872 = vmatprep.subr.bf16.mxu0 %v871_v10  ;;  %v895_v42 = vpack.c.bf16 %v711_v41, %v710_v40  ;;  %v899_v46 = vpack.c.bf16 %v713_v44, %v712_v43  ;;  %v714_v48 = vld [vmem:[%s1154_s1 + $0xa0] sm:$0xff]  ;;  %v715_v49 = vld [vmem:[%s1154_s1 + $0xa8] sm:$0xff]  ;;  %v716_v51 = vld [vmem:[%s1154_s1 + $0xb0] sm:$0xff] }
   0xf   : > { %s199_s8 = scalar_lea.vmem %s1153_s0, %s722_s29  ;;  %916 = vmatpush3.bf16.msra.mxu1 %v915_v23  ;;  %v903_v50 = vpack.c.bf16 %v715_v49, %v714_v48  ;;  %v717_v52 = vld [vmem:[%s1154_s1 + $0xb8] sm:$0xff]  ;;  %v520_v55 = vld [vmem:[%s1155_s2 + $0x30] sm:$0xff]  ;;  %v522_v58 = vld [vmem:[%s1155_s2 + $0x40] sm:$0xff] }
  0x10   : > { %v212_v13 = vld [vmem:[%s199_s8] sm:$0xff]  ;;  %v213_v14 = vld [vmem:[%s199_s8 + $0x8] sm:$0xff]  ;;  %917 = vmatprep.subr.bf16.mxu1 %v959_v9  ;;  %v907_v53 = vpack.c.bf16 %v717_v52, %v716_v51  ;;  %v521_v56 = vld [vmem:[%s1155_s2 + $0x38] sm:$0xff]  ;;  %s204_s8 = scalar_lea.vmem %s1156_s3, %s722_s29  ;;  %s697_s29 = sshll.u32 %s1159_s16, 1 }
  0x11   : > { %215 = vst.msk [vmem:[#allocation2 + $0x1] sm:$0xff] %vm214_vm1, %v212_v13  ;;  %216 = vst.msk [vmem:[#allocation2 + $0x9] sm:$0xff] %vm214_vm1, %v213_v14  ;;  %874 = vmatpush3.bf16.msra.mxu0 %v871_v10  ;;  %v921_v57 = vpack.c.bf16 %v521_v56, %v520_v55  ;;  %v523_v59 = vld [vmem:[%s1155_s2 + $0x48] sm:$0xff]  ;;  %v524_v61 = vld [vmem:[%s1155_s2 + $0x50] sm:$0xff]  ;;  %s208_s11 = scalar_lea.vmem %s1157_s4, %s697_s29 }
  0x12   : > { %876 = vmatprep.subr.bf16.mxu0 %v875_v16  ;;  %v924_v60 = vpack.c.bf16 %v523_v59, %v522_v58  ;;  %v525_v62 = vld [vmem:[%s1155_s2 + $0x58] sm:$0xff]  ;;  %v526_v0 = vld [vmem:[%s1155_s2 + $0x60] sm:$0xff]  ;;  %v527_v1 = vld [vmem:[%s1155_s2 + $0x68] sm:$0xff] }
  0x13   : > { %919 = vmatpush3.bf16.msra.mxu1 %v918_v33  ;;  %v927_v63 = vpack.c.bf16 %v525_v62, %v524_v61  ;;  %v930_v2 = vpack.c.bf16 %v527_v1, %v526_v0  ;;  %v528_v3 = vld [vmem:[%s1155_s2 + $0x70] sm:$0xff]  ;;  %v529_v4 = vld [vmem:[%s1155_s2 + $0x78] sm:$0xff] }
  0x14   : > { %920 = vmatprep.subr.bf16.mxu1 %v959_v9  ;;  %v933_v5 = vpack.c.bf16 %v529_v4, %v528_v3 }
  0x15   : > { %878 = vmatpush3.bf16.msra.mxu0 %v875_v16 }
  0x16   : > { %880 = vmatprep.subr.bf16.mxu0 %v879_v24 }
  0x17   : > { %922 = vmatpush3.bf16.msra.mxu1 %v921_v57 }
  0x18   : > { %v227_v27 = vld [vmem:[#allocation2 + $0x1] sm:$0xff]  ;;  %v228_v30 = vld [vmem:[#allocation2 + $0x9] sm:$0xff]  ;;  %923 = vmatprep.subr.bf16.mxu1 %v959_v9 }
  0x19   : > { %787 = vmatprep.mubr.msk.f32.mxu0 %vm214_vm1, %v227_v27  ;;  %v217_v32 = vld [vmem:[#allocation2] sm:$0xff]  ;;  %v218_v45 = vld [vmem:[#allocation2 + $0x8] sm:$0xff] }
  0x1a   : > { %788 = vmatmul.mubr.msk.f32.vlgmr.msra.gmra.mrb[0].mxu0 %vm214_vm1, %v228_v30  ;;  %v400_v47 = vld [vmem:[#allocation2 + $0x2] sm:$0xff]  ;;  %v401_v54 = vld [vmem:[#allocation2 + $0xa] sm:$0xff] }
  0x1b   : > { %882 = vmatpush3.bf16.msra.mxu0 %v879_v24  ;;  %806 = vmatprep.mubr.msk.f32.mxu0 %vm214_vm1, %v217_v32 }
  0x1c   : > { %884 = vmatprep.subr.bf16.mxu0 %v883_v31  ;;  %925 = vmatpush3.bf16.msra.mxu1 %v924_v60 }
  0x1d   : > { %926 = vmatprep.subr.bf16.mxu1 %v959_v9 }
  0x1f   : > { %886 = vmatpush3.bf16.msra.mxu0 %v883_v31 }
  0x20   : > { %888 = vmatprep.subr.bf16.mxu0 %v887_v36  ;;  %928 = vmatpush3.bf16.msra.mxu1 %v927_v63 }
  0x21   : > { %929 = vmatprep.subr.bf16.mxu1 %v959_v9 }
  0x23   : > { %890 = vmatpush3.bf16.msra.mxu0 %v887_v36 }
  0x24   : > { %892 = vmatprep.subr.bf16.mxu0 %v891_v39  ;;  %931 = vmatpush3.bf16.msra.mxu1 %v930_v2 }
  0x25   : > { %932 = vmatprep.subr.bf16.mxu1 %v959_v9 }
  0x27   : > { %894 = vmatpush3.bf16.msra.mxu0 %v891_v39 }
  0x28   : > { %896 = vmatprep.subr.bf16.mxu0 %v895_v42  ;;  %934 = vmatpush3.bf16.msra.mxu1 %v933_v5 }
  0x2a   : > { %807 = vmatmul.mubr.msk.f32.vlgmr.msra.gmra.mrb[0].mxu0 %vm214_vm1, %v218_v45 }
  0x2b   : > { %898 = vmatpush3.bf16.msra.mxu0 %v895_v42  ;;  %825 = vmatprep.mubr.msk.f32.mxu0 %vm214_vm1, %v400_v47 }
  0x2c   : > { %900 = vmatprep.subr.bf16.mxu0 %v899_v46 }
  0x2f   : > { %902 = vmatpush3.bf16.msra.mxu0 %v899_v46 }
  0x30   : > { %904 = vmatprep.subr.bf16.mxu0 %v903_v50 }
  0x33   : > { %906 = vmatpush3.bf16.msra.mxu0 %v903_v50 }
  0x34   : > { %908 = vmatprep.subr.bf16.mxu0 %v907_v53 }
  0x37   : > { %910 = vmatpush3.bf16.msra.mxu0 %v907_v53 }
  0x3a   : > { %826 = vmatmul.mubr.msk.f32.vlgmr.msra.gmra.mrb[0].mxu0 %vm214_vm1, %v401_v54 }
 0x10d   : > { %v827_v6 = vpop.f32.mrb[0].mxu0 }
 0x10e   : > { %v504_v7 = vmul.f32 %v827_v6, %v827_v6  ;;  %v483_v10 = vpop.f32.mrb[1].mxu0  ;;  %495 = vst [vmem:[%s204_s8 + $0x8] sm:$0xff] %v827_v6 }
 0x10f   : > { %494 = vst [vmem:[%s204_s8] sm:$0xff] %v483_v10  ;;  %v496_v11 = vadd.f32 %v827_v6, %v483_v10  ;;  %v503_v12 = vmul.f32 %v483_v10, %v483_v10 }
 0x111   : > { %v497_v13 = vrot.slane %v496_v11, 4  ;;  %v505_v9 = vadd.f32 %v504_v7, %v503_v12 }
 0x113   : > { %v498_v14 = vadd.f32 %v497_v13, %v496_v11  ;;  %v506_v15 = vrot.slane %v505_v9, 4 }
 0x115   : > { %v499_v16 = vrot.slane %v498_v14, 2  ;;  %v507_v8 = vadd.f32 %v506_v15, %v505_v9 }
 0x117   : > { %v500_v17 = vadd.f32 %v499_v16, %v498_v14  ;;  %v508_v18 = vrot.slane %v507_v8, 2 }
 0x119   : > { %v501_v19 = vrot.slane %v500_v17, 1  ;;  %v509_v20 = vadd.f32 %v508_v18, %v507_v8 }
 0x11b   : > { %v510_v21 = vrot.slane %v509_v20, 1  ;;  %v502_v22 = vadd.f32 %v501_v19, %v500_v17 }
 0x11d   : > { %v511_v23 = vadd.f32 %v510_v21, %v509_v20 }
 0x11f   : > { %v513_v24 = vsel %vm512_vm3, %v502_v22, %v511_v23 }
 0x120   : > { %861 = vmatmul.mubr.f32.vlgmr.msra.gmra.mrb[0].mxu1 %v513_v24 }
 0x1f3   : > { %v596_v25 = vpop.f32.mrb[0].mxu1 }
 0x1f4   : > { %601 = vst.msk [vmem:[%s208_s11] sm:$0x3] %vm600_vm4, %v596_v25  ;;  %v862_v26 = vpop.f32.mrb[1].mxu1 }
 0x1f5 PF: > { %s15_s15 = sadd.s32 1, %s956_s15  }
 0x1f6   : > { %p12_p4 = scmp.ge.s32.totalorder %s15_s15, 4  }
 0x1f8   :  { %14 = sbr.rel (!%p12_p4) target bundleno = 1 (0x1), region = 76 }

</bundles_post_ra>
